<compile_context>
chip_gen: v5e
topology: v5e:2x2
jax: 0.10.0
libtpu: 0.0.40
codegen_flags: <defaults>
</compile_context>

<pallas_src>
import jax
import jax.numpy as jnp
from jax.experimental import pallas as pl
from jax.experimental.pallas import tpu as pltpu


def polarnet_kernel(x_ref, w1_ref, b1_ref, w2_ref, b2_ref, out_ref):
    # x_ref : (2, TB)  row 0 = x coords, row 1 = y coords (batch on lanes)
    # w1_ref: (H, 2)   PyTorch nn.Linear(2, H).weight layout
    # b1_ref: (H, 1)
    # w2_ref: (H, 1)   nn.Linear(H, 1).weight as a column
    # b2_ref: (1, 1)   SMEM scalar
    # out_ref: (1, TB)
    px = x_ref[0:1, :]                       # (1, TB) lane-dense
    py = x_ref[1:2, :]                       # (1, TB)

    # Polar transform (same semantics as torch.sqrt / torch.atan2).
    r = jnp.sqrt(px * px + py * py)          # (1, TB)
    a = jnp.arctan2(py, px)                  # (1, TB)

    # hid_sum[h, b] = W1[h,0]*r[b] + W1[h,1]*a[b] + b1[h]
    # == (cat([r, a], -1) @ W1.T + b1).T, written without concat / matmul;
    # r, a broadcast along sublanes (cheap), W1 columns broadcast along lanes.
    hid_sum = (w1_ref[:, 0:1] * r
               + w1_ref[:, 1:2] * a
               + b1_ref[...])                # (H, TB)
    hidden = jnp.tanh(hid_sum)               # (H, TB)  == self.tan_h1 (transposed)

    # out = sigmoid(W2 @ hidden + b2): VPU multiply + sublane reduce over H.
    out_sum = jnp.sum(hidden * w2_ref[...], axis=0, keepdims=True) + b2_ref[0, 0]
    out_ref[...] = jax.nn.sigmoid(out_sum)   # (1, TB) lane-dense store


def polarnet_forward(x, w1, b1, w2, b2, *, batch_tile=256):
    """x: (B, 2); w1: (H, 2); b1: (H,); w2: (1, H); b2: (1,). Returns (B, 1)."""
    B = x.shape[0]
    H = w1.shape[0]
    grid_b = pl.cdiv(B, batch_tile)
    Bp = grid_b * batch_tile

    # Batch on lanes; zero-pad the ragged tail (padding rows are discarded).
    xt = jnp.pad(x.astype(jnp.float32).T, ((0, 0), (0, Bp - B)))

    out_t = pl.pallas_call(
        polarnet_kernel,
        out_shape=jax.ShapeDtypeStruct((1, Bp), jnp.float32),
        grid=(grid_b,),
        in_specs=[
            pl.BlockSpec((2, batch_tile), lambda i: (0, i)),      # x   (2, Bp)
            pl.BlockSpec((H, 2), lambda i: (0, 0)),               # W1  (H, 2)
            pl.BlockSpec((H, 1), lambda i: (0, 0)),               # b1  (H, 1)
            pl.BlockSpec((H, 1), lambda i: (0, 0)),               # W2  (H, 1)
            pl.BlockSpec((1, 1), lambda i: (0, 0),
                         memory_space=pltpu.SMEM),                # b2  (1, 1)
        ],
        out_specs=pl.BlockSpec((1, batch_tile), lambda i: (0, i)),
        compiler_params=pltpu.CompilerParams(
            dimension_semantics=("parallel",)),
    )(xt, w1, b1.reshape(H, 1), w2.reshape(H, 1), b2.reshape(1, 1))

    return out_t[0, :B].reshape(B, 1)


def init_params(key, num_hid):
    # Deterministic init mimicking nn.Linear defaults (PyTorch weight layout):
    # uniform(-1/sqrt(fan_in), 1/sqrt(fan_in)).
    k1, k2, k3, k4 = jax.random.split(key, 4)
    bound1 = 1.0 / jnp.sqrt(2.0)
    bound2 = 1.0 / jnp.sqrt(float(num_hid))
    w1 = jax.random.uniform(k1, (num_hid, 2), jnp.float32, -bound1, bound1)
    b1 = jax.random.uniform(k2, (num_hid,), jnp.float32, -bound1, bound1)
    w2 = jax.random.uniform(k3, (1, num_hid), jnp.float32, -bound2, bound2)
    b2 = jax.random.uniform(k4, (1,), jnp.float32, -bound2, bound2)
    return w1, b1, w2, b2


def reference_forward(x, w1, b1, w2, b2):
    # Pure-JAX reference mirroring the PyTorch module exactly.
    r = jnp.sqrt(x[:, 0] ** 2 + x[:, 1] ** 2).reshape(-1, 1)
    a = jnp.arctan2(x[:, 1], x[:, 0]).reshape(-1, 1)
    feat = jnp.concatenate([r, a], axis=-1)
    hidden = jnp.tanh(feat @ w1.T + b1)
    return jax.nn.sigmoid(hidden @ w2.T + b2)


if __name__ == "__main__":
    key = jax.random.PRNGKey(0)
    k_in, k_par = jax.random.split(key)

    num_hid = 32
    w1, b1, w2, b2 = init_params(k_par, num_hid)

    # Test both a tiny batch and a ragged (non-multiple-of-tile) batch.
    for B in (8, 1000):
        x = jax.random.normal(jax.random.fold_in(k_in, B), (B, 2), jnp.float32)

        out = polarnet_forward(x, w1, b1, w2, b2)
        out = jax.block_until_ready(out)

        ref = reference_forward(x, w1, b1, w2, b2)
        assert out.shape == (B, 1)
        assert jnp.allclose(out, ref, atol=1e-5, rtol=1e-5)

    print("KERNEL_OK")
</pallas_src>

<mosaic_0001>
module attributes {stable_mosaic.version = 11 : i64} {
  func.func @polarnet_kernel(%arg0: i32, %arg1: memref<2x256xf32, #tpu.memory_space<vmem>>, %arg2: memref<32x2xf32, #tpu.memory_space<vmem>>, %arg3: memref<32x1xf32, #tpu.memory_space<vmem>>, %arg4: memref<32x1xf32, #tpu.memory_space<vmem>>, %arg5: memref<1x1xf32, #tpu.memory_space<smem>>, %arg6: memref<1x256xf32, #tpu.memory_space<vmem>>) attributes {dimension_semantics = [#tpu.dimension_semantics<parallel>], iteration_bounds = array<i64: 1>, scalar_prefetch = 0 : i64, scratch_operands = 0 : i64, tpu.core_type = #tpu.core_type<tc>, window_params = [{transform_indices = @transform_0, window_bounds = array<i64: 2, 256>}, {pipeline_mode = #tpu.pipeline_mode<synchronous>, transform_indices = @transform_1, window_bounds = array<i64: 32, 2>}, {pipeline_mode = #tpu.pipeline_mode<synchronous>, transform_indices = @transform_2, window_bounds = array<i64: 32, 1>}, {pipeline_mode = #tpu.pipeline_mode<synchronous>, transform_indices = @transform_3, window_bounds = array<i64: 32, 1>}, {transform_indices = @transform_4, window_bounds = array<i64: 1, 1>}, {transform_indices = @transform_5, window_bounds = array<i64: 1, 256>}]} {
    %c0 = arith.constant 0 : index
    %c0_0 = arith.constant 0 : index
    %0 = vector.load %arg1[%c0, %c0_0] : memref<2x256xf32, #tpu.memory_space<vmem>>, vector<1x256xf32>
    %c1 = arith.constant 1 : index
    %c0_1 = arith.constant 0 : index
    %1 = vector.load %arg1[%c1, %c0_1] : memref<2x256xf32, #tpu.memory_space<vmem>>, vector<1x256xf32>
    %2 = arith.mulf %0, %0 : vector<1x256xf32>
    %3 = arith.mulf %1, %1 : vector<1x256xf32>
    %4 = arith.addf %2, %3 : vector<1x256xf32>
    %5 = math.sqrt %4 : vector<1x256xf32>
    %6 = math.atan2 %1, %0 : vector<1x256xf32>
    %c0_2 = arith.constant 0 : index
    %c0_3 = arith.constant 0 : index
    %7 = vector.load %arg2[%c0_2, %c0_3] : memref<32x2xf32, #tpu.memory_space<vmem>>, vector<32x1xf32>
    %8 = vector.broadcast %7 : vector<32x1xf32> to vector<32x256xf32>
    %9 = vector.broadcast %5 : vector<1x256xf32> to vector<32x256xf32>
    %10 = arith.mulf %8, %9 : vector<32x256xf32>
    %c0_4 = arith.constant 0 : index
    %c1_5 = arith.constant 1 : index
    %11 = vector.load %arg2[%c0_4, %c1_5] : memref<32x2xf32, #tpu.memory_space<vmem>>, vector<32x1xf32>
    %12 = vector.broadcast %11 : vector<32x1xf32> to vector<32x256xf32>
    %13 = vector.broadcast %6 : vector<1x256xf32> to vector<32x256xf32>
    %14 = arith.mulf %12, %13 : vector<32x256xf32>
    %15 = arith.addf %10, %14 : vector<32x256xf32>
    %c0_6 = arith.constant 0 : index
    %c0_7 = arith.constant 0 : index
    %16 = vector.load %arg3[%c0_6, %c0_7] : memref<32x1xf32, #tpu.memory_space<vmem>>, vector<32x1xf32>
    %17 = vector.broadcast %16 : vector<32x1xf32> to vector<32x256xf32>
    %18 = arith.addf %15, %17 : vector<32x256xf32>
    %19 = math.tanh %18 : vector<32x256xf32>
    %c0_8 = arith.constant 0 : index
    %c0_9 = arith.constant 0 : index
    %20 = vector.load %arg4[%c0_8, %c0_9] : memref<32x1xf32, #tpu.memory_space<vmem>>, vector<32x1xf32>
    %21 = vector.broadcast %20 : vector<32x1xf32> to vector<32x256xf32>
    %22 = arith.mulf %19, %21 : vector<32x256xf32>
    %cst = arith.constant dense<0.000000e+00> : vector<256xf32>
    %23 = vector.multi_reduction <add>, %22, %cst [0] : vector<32x256xf32> to vector<256xf32>
    %24 = vector.shape_cast %23 : vector<256xf32> to vector<1x256xf32>
    %c0_10 = arith.constant 0 : index
    %c0_11 = arith.constant 0 : index
    %25 = memref.load %arg5[%c0_10, %c0_11] : memref<1x1xf32, #tpu.memory_space<smem>>
    %26 = vector.broadcast %25 : f32 to vector<1x256xf32>
    %27 = arith.addf %24, %26 : vector<1x256xf32>
    %28 = arith.negf %27 : vector<1x256xf32>
    %29 = math.exp %28 : vector<1x256xf32>
    %cst_12 = arith.constant 1.000000e+00 : f32
    %30 = vector.broadcast %cst_12 : f32 to vector<1x256xf32>
    %31 = arith.addf %30, %29 : vector<1x256xf32>
    %32 = arith.divf %30, %31 : vector<1x256xf32>
    %c0_13 = arith.constant 0 : index
    %c0_14 = arith.constant 0 : index
    %33 = vector.load %arg6[%c0_13, %c0_14] : memref<1x256xf32, #tpu.memory_space<vmem>>, vector<1x256xf32>
    tpu.vector_store %arg6[%c0_13, %c0_14], %32 {strides = array<i32>} : memref<1x256xf32, #tpu.memory_space<vmem>>, vector<1x256xf32>,
    return
  }
  func.func @transform_0(%arg0: i32) -> (i32, i32) {
    %c0_i32 = arith.constant 0 : i32
    %c0_i32_0 = arith.constant 0 : i32
    return %c0_i32, %arg0 : i32, i32
  }
  func.func @transform_1(%arg0: i32) -> (i32, i32) {
    %c0_i32 = arith.constant 0 : i32
    %c0_i32_0 = arith.constant 0 : i32
    %c0_i32_1 = arith.constant 0 : i32
    return %c0_i32, %c0_i32_0 : i32, i32
  }
  func.func @transform_2(%arg0: i32) -> (i32, i32) {
    %c0_i32 = arith.constant 0 : i32
    %c0_i32_0 = arith.constant 0 : i32
    %c0_i32_1 = arith.constant 0 : i32
    return %c0_i32, %c0_i32_0 : i32, i32
  }
  func.func @transform_3(%arg0: i32) -> (i32, i32) {
    %c0_i32 = arith.constant 0 : i32
    %c0_i32_0 = arith.constant 0 : i32
    %c0_i32_1 = arith.constant 0 : i32
    return %c0_i32, %c0_i32_0 : i32, i32
  }
  func.func @transform_4(%arg0: i32) -> (i32, i32) {
    %c0_i32 = arith.constant 0 : i32
    %c0_i32_0 = arith.constant 0 : i32
    %c0_i32_1 = arith.constant 0 : i32
    return %c0_i32, %c0_i32_0 : i32, i32
  }
  func.func @transform_5(%arg0: i32) -> (i32, i32) {
    %c0_i32 = arith.constant 0 : i32
    %c0_i32_0 = arith.constant 0 : i32
    return %c0_i32, %arg0 : i32, i32
  }
}

</mosaic_0001>

<bundles_post_ra>
// kernel: tpu_custom_call.1
= control target key start
LH: loop header
LB: loop body
LE: loop exit
PB: predicated region body
PF: predicated region fallthrough
CT: control target
= control target key end

     0   :  { %v401_v1 = vmov 1   ;;  %v402_v2 = vmov 0   ;;  %s520_s0 = inlined_call_operand.vmem [shape: f32[2,256], index: 0, kind: input, shape index: {}]   ;;  %s521_s1 = inlined_call_operand.vmem [shape: f32[32,2], index: 1, kind: input, shape index: {}]   ;;  %s522_s2 = inlined_call_operand.vmem [shape: f32[32,1], index: 2, kind: input, shape index: {}]   ;;  %s523_s3 = inlined_call_operand.vmem [shape: f32[32,1], index: 3, kind: input, shape index: {}]   ;;  %s524_s4 = inlined_call_operand.<no memory space> [shape: f32[1,1], index: 4, kind: input, shape index: {}]   ;;  %s525_s5 = inlined_call_operand.hbm [shape: f32[1,256], index: 5, kind: output, shape index: {}]  }
   0x1   :  { %v100_v0 = vld [vmem:[%s521_s1] sm:$0xff]  ;;  %342 = vset.pattern.permute.xlu1 %v401_v1  ;;  %341 = vset.pattern.permute.xlu0 %v402_v2  ;;  %v102_v3 = vld [vmem:[%s521_s1 + $0x10] sm:$0xff] }
   0x2   :  { %138 = vperm.xlu1 %342, %v100_v0   ;;  %106 = vperm.xlu0 %341, %v100_v0  }
   0x3   :  { %343 = vset.pattern.permute.xlu2 %v402_v2 }
   0x4   :  { %11 = vsyncpa [#allocation4], 0  ;;  %116 = vperm.xlu2 %343, %v102_v3   ;;  %v101_v4 = vld [vmem:[%s521_s1 + $0x8] sm:$0xff]  ;;  %v448_v5 = vld [vmem:[%s520_s0] ss:$2 sm:$0x3] }
   0x5   :  { %v453_v6 = vld [vmem:[%s520_s0 + $0x1] ss:$2 sm:$0x3]  ;;  %v456_v7 = vand.u32 2147483647, %v448_v5  ;;  %v103_v10 = vld [vmem:[%s521_s1 + $0x18] sm:$0xff]  ;;  %vm87_vm7 = vcmp.ne.f32.partialorder %v448_v5, %v448_v5  ;;  %v25_v58 = vmul.f32 %v448_v5, %v448_v5 }
   0x6   :  { %v459_v8 = vand.u32 2147483647, %v453_v6  ;;  %v174_v11 = vld [vmem:[%s522_s2] sm:$0xff]  ;;  %v175_v13 = vld [vmem:[%s522_s2 + $0x8] sm:$0xff]  ;;  %v176_v15 = vld [vmem:[%s522_s2 + $0x10] sm:$0xff]  ;;  %vm80_vm5 = vcmp.lt.f32.partialorder %v448_v5, 0.0  ;;  %vm88_vm9 = vcmp.ne.f32.partialorder %v453_v6, %v453_v6  ;;  %v26_v59 = vmul.f32 %v453_v6, %v453_v6 }
   0x7   :  { %v177_v17 = vld [vmem:[%s522_s2 + $0x18] sm:$0xff]  ;;  %v214_v24 = vld [vmem:[%s523_s3] sm:$0xff]  ;;  %v215_v26 = vld [vmem:[%s523_s3 + $0x8] sm:$0xff]  ;;  %vm83_vm6 = vcmp.lt.s32.totalorder %v448_v5, 0  ;;  %v403_v51 = vmov 0.0   ;;  %vm85_vm8 = vcmp.eq.f32.partialorder %v453_v6, 0.0 }
   0x8   :  { %v43_v9 = vmax.f32 %v456_v7, %v459_v8  ;;  %v42_v23 = vmin.f32 %v456_v7, %v459_v8  ;;  %v216_v29 = vld [vmem:[%s523_s3 + $0x10] sm:$0xff]  ;;  %v217_v32 = vld [vmem:[%s523_s3 + $0x18] sm:$0xff]  ;;  %vm77_vm4 = vcmp.gt.f32.partialorder %v459_v8, %v456_v7  ;;  %v84_v52 = vsel %vm83_vm6, 3.1415927, %v403_v51  ;;  %vm89_vm10 = vmor %vm87_vm7, %vm88_vm9  ;;  %s324_s22 = sshll.u32 %s525_s5, 4  ;;  %s325_s22 = int_to_ptr.hbm [resolvable:$true] %s324_s22 }
   0x9   :  { %vm93_vm11 = vcmp.eq.s32.totalorder %v456_v7, inf  ;;  %vm94_vm12 = vcmp.eq.s32.totalorder %v459_v8, inf  ;;  %v404_v55 = vmov 0.7853982   ;;  %v98_v61 = vand.u32 2147483648, %v453_v6 }
   0xa   :  { %142 = vperm.xlu1 %342, %v101_v4   ;;  %111 = vperm.xlu0 %341, %v101_v4   ;;  %347 = vrcp.f32 %v43_v9  ;;  %v55_v19 = vand.u32 2147483648, %v43_v9  ;;  %vm49_vm0 = vweird.f32 %v43_v9  ;;  %v53_v20 = vand.u32 2147483647, %v43_v9  ;;  %vm95_vm13 = vmand %vm93_vm11, %vm94_vm12 }
   0xb   :  { %v92_v56 = vsel %vm80_vm5, 2.3561945, %v404_v55  ;;  %v27_v0 = vadd.f32 %v26_v59, %v25_v58  ;;  %vm309_vm7 = vcmask 1040384  }
   0xc   :  { %344 = vset.pattern.permute.xlu2 %v401_v1  ;;  %v56_v22 = vor.u32 1.1754944e-38, %v55_v19  ;;  %vm54_vm3 = vcmp.eq.f32.partialorder %v53_v20, 8.507059e+37 }
   0xd   :  { %146 = vperm.xlu2 %344, %v102_v3   ;;  %349 = vrsqrt.f32 %v27_v0  ;;  %vm35_vm14 = vcmp.eq.f32.partialorder %v27_v0, inf  ;;  %vm37_vm15 = vcmp.eq.f32.partialorder %v27_v0, 0.0 }
  0x10   :  { %v348_v12 = vpop.eup %347 }
  0x11   :  { %v45_v14 = vmul.f32 %v348_v12, %v43_v9  ;;  %vm50_vm1 = vweird.f32 %v348_v12 }
  0x12   :  { %150 = vperm.xlu1 %342, %v103_v10   ;;  %121 = vperm.xlu0 %341, %v103_v10   ;;  %vm51_vm2 = vmor %vm49_vm0, %vm50_vm1 }
  0x13   :  { %v46_v16 = vsub.f32 1.0, %v45_v14 }
  0x15   :  { %345 = vset.pattern.permute.xlu2 %v402_v2  ;;  %v47_v18 = vmul.f32 %v348_v12, %v46_v16 }
  0x16   :  { %180 = vperm.xlu2 %345, %v174_v11  }
  0x17   :  { %v48_v21 = vadd.f32 %v348_v12, %v47_v18 }
  0x19   :  { %v52_v25 = vsel %vm51_vm2, %v348_v12, %v48_v21 }
  0x1a   :  { %346 = vset.pattern.permute.xlu1 %v402_v2  ;;  %185 = vperm.xlu0 %341, %v175_v13   ;;  %v57_v27 = vsel %vm54_vm3, %v56_v22, %v52_v25  ;;  %v350_v2 = vpop.eup %349  ;;  %v38_v13 = vand.u32 2147483648, %v27_v0 }
  0x1b   :  { %190 = vperm.xlu1 %346, %v176_v15   ;;  %v58_v28 = vmul.f32 %v57_v27, %v42_v23  ;;  %v29_v3 = vmul.f32 %v350_v2, %v27_v0 }
  0x1d   :  { %v59_v30 = vmul.f32 %v58_v28, %v58_v28  ;;  %v30_v4 = vmul.f32 %v350_v2, %v29_v3 }
  0x1e   :  { %195 = vperm.xlu2 %345, %v177_v17  }
  0x1f   :  { %v60_v31 = vmul.f32 0.002785687, %v59_v30  ;;  %v31_v7 = vmul.f32 0.5, %v30_v4 }
  0x21   :  { %v61_v33 = vadd.f32 -0.015866, %v60_v31  ;;  %v32_v8 = vsub.f32 1.5, %v31_v7 }
  0x22   :  { %220 = vperm.xlu0 %341, %v214_v24  }
  0x23   :  { %225 = vperm.xlu1 %346, %v215_v26   ;;  %v62_v34 = vmul.f32 %v61_v33, %v59_v30  ;;  %v33_v9 = vmul.f32 %v350_v2, %v32_v8 }
  0x25   :  { %v63_v35 = vadd.f32 0.04247222, %v62_v34  ;;  %v34_v11 = vmul.f32 %v33_v9, %v27_v0 }
  0x26   :  { %230 = vperm.xlu2 %345, %v216_v29  }
  0x27   :  { %v64_v36 = vmul.f32 %v63_v35, %v59_v30  ;;  %v36_v14 = vsel %vm35_vm14, %v27_v0, %v34_v11 }
  0x28   :  { %v39_v6 = vsel %vm37_vm15, %v38_v13, %v36_v14 }
  0x29   :  { %v65_v37 = vadd.f32 -0.074975304, %v64_v36  ;;  %v125_v18 = vperm.slane %v39_v6, 0  ;;  %v126_v20 = vperm.slane %v39_v6, 1 }
  0x2a   :  { %235 = vperm.xlu0 %341, %v217_v32  }
  0x2b   :  { %v66_v38 = vmul.f32 %v65_v37, %v59_v30 }
  0x2d   :  { %v67_v39 = vadd.f32 0.1064488, %v66_v38 }
  0x2f   :  { %v68_v40 = vmul.f32 %v67_v39, %v59_v30 }
  0x31   :  { %v69_v41 = vadd.f32 -0.14207031, %v68_v40 }
  0x33   :  { %v70_v42 = vmul.f32 %v69_v41, %v59_v30 }
  0x35   :  { %v71_v43 = vadd.f32 0.19993454, %v70_v42 }
  0x37   :  { %v72_v44 = vmul.f32 %v71_v43, %v59_v30 }
  0x39   :  { %v73_v45 = vadd.f32 -0.33333147, %v72_v44 }
  0x3b   :  { %v74_v46 = vmul.f32 %v73_v45, %v59_v30 }
  0x3d   :  { %v75_v47 = vmul.f32 %v74_v46, %v58_v28 }
  0x3f   :  { %v76_v48 = vadd.f32 %v75_v47, %v58_v28 }
  0x41   :  { %v78_v49 = vsub.f32 1.5707964, %v76_v48 }
  0x43   :  { %v79_v50 = vsel %vm77_vm4, %v78_v49, %v76_v48 }
  0x44   :  { %v81_v53 = vsub.f32 3.1415927, %v79_v50 }
  0x46   :  { %v82_v54 = vsel %vm80_vm5, %v81_v53, %v79_v50 }
  0x47   :  { %v86_v57 = vsel %vm85_vm8, %v84_v52, %v82_v54 }
  0x48   :  { %v90_v60 = vsel %vm89_vm10, nan, %v86_v57 }
  0x49   :  { %v96_v62 = vsel %vm95_vm13, %v92_v56, %v90_v60 }
  0x4a   :  { %v97_v63 = vand.u32 2147483647, %v96_v62 }
  0x4c   :  { %v99_v1 = vor.u32 %v98_v61, %v97_v63 }
  0x4e   :  { %v154_v19 = vperm.slane %v99_v1, 0  ;;  %v155_v21 = vperm.slane %v99_v1, 1 }
  0x5e   :  { %v117_v10 = vpop.permute.xlu2 %116 }
  0x5f   :  { %v133_v35 = vmul.f32 %v125_v18, %v117_v10  ;;  %v134_v36 = vmul.f32 %v126_v20, %v117_v10 }
  0x67   :  { %v147_v15 = vpop.permute.xlu2 %146 }
  0x68   :  { %v162_v37 = vmul.f32 %v154_v19, %v147_v15  ;;  %v163_v38 = vmul.f32 %v155_v21, %v147_v15 }
  0x6a   :  { %v170_v48 = vadd.f32 %v162_v37, %v133_v35  ;;  %v171_v49 = vadd.f32 %v163_v38, %v134_v36 }
  0x70   :  { %v181_v29 = vpop.permute.xlu2 %180 }
  0x74   :  { %v139_v5 = vpop.permute.xlu1 %138  ;;  %v107_v12 = vpop.permute.xlu0 %106 }
  0x75   :  { %v158_v22 = vmul.f32 %v154_v19, %v139_v5  ;;  %v129_v23 = vmul.f32 %v125_v18, %v107_v12  ;;  %v159_v24 = vmul.f32 %v155_v21, %v139_v5  ;;  %v130_v25 = vmul.f32 %v126_v20, %v107_v12 }
  0x77   :  { %v166_v28 = vadd.f32 %v158_v22, %v129_v23  ;;  %v167_v30 = vadd.f32 %v159_v24, %v130_v25 }
  0x78   :  { %v196_v54 = vpop.permute.xlu2 %195 }
  0x79   :  { %v198_v39 = vadd.f32 %v181_v29, %v166_v28  ;;  %v199_v42 = vadd.f32 %v181_v29, %v167_v30 }
  0x7b   :  { %351 = vtanh.f32 %v198_v39 }
  0x7c   :  { %v143_v16 = vpop.permute.xlu1 %142  ;;  %v112_v17 = vpop.permute.xlu0 %111  ;;  %353 = vtanh.f32 %v199_v42 }
  0x7d   :  { %v160_v31 = vmul.f32 %v154_v19, %v143_v16  ;;  %v161_v32 = vmul.f32 %v155_v21, %v143_v16  ;;  %v131_v33 = vmul.f32 %v125_v18, %v112_v17  ;;  %v132_v34 = vmul.f32 %v126_v20, %v112_v17 }
  0x7f   :  { %v168_v45 = vadd.f32 %v160_v31, %v131_v33  ;;  %v169_v46 = vadd.f32 %v161_v32, %v132_v34  ;;  %v265_v32 = vstv %s524_s4  ;;  %s405_s4 = smov [#allocation3]  }
  0x80   :  { %v231_v10 = vpop.permute.xlu2 %230  ;;  %s322_s19 = sshll.u32 %s405_s4, 4  ;;  %s323_s19 = int_to_ptr.vmem [resolvable:$true] %s322_s19 }
  0x81   :  { %v352_v60 = vpop.eup %351 }
  0x82   :  { %v354_v61 = vpop.eup %353 }
  0x84   :  { %v151_v26 = vpop.permute.xlu1 %150  ;;  %v122_v27 = vpop.permute.xlu0 %121 }
  0x85   :  { %v164_v40 = vmul.f32 %v154_v19, %v151_v26  ;;  %v135_v41 = vmul.f32 %v125_v18, %v122_v27  ;;  %v165_v43 = vmul.f32 %v155_v21, %v151_v26  ;;  %v136_v44 = vmul.f32 %v126_v20, %v122_v27 }
  0x87   :  { %v172_v50 = vadd.f32 %v164_v40, %v135_v41  ;;  %v173_v55 = vadd.f32 %v165_v43, %v136_v44 }
  0x89   :  { %v204_v58 = vadd.f32 %v196_v54, %v172_v50  ;;  %v205_v59 = vadd.f32 %v196_v54, %v173_v55 }
  0x8c   :  { %v186_v47 = vpop.permute.xlu0 %185 }
  0x8d   :  { %v200_v51 = vadd.f32 %v186_v47, %v168_v45  ;;  %v201_v52 = vadd.f32 %v186_v47, %v169_v46  ;;  %v191_v53 = vpop.permute.xlu1 %190 }
  0x8e   :  { %v202_v56 = vadd.f32 %v191_v53, %v170_v48  ;;  %v203_v57 = vadd.f32 %v191_v53, %v171_v49 }
  0x8f   :  { %355 = vtanh.f32 %v200_v51 }
  0x90   :  { %357 = vtanh.f32 %v201_v52 }
  0x91   :  { %359 = vtanh.f32 %v202_v56 }
  0x92   :  { %361 = vtanh.f32 %v203_v57 }
  0x93   :  { %363 = vtanh.f32 %v204_v58  ;;  %v312_v58 = vlaneseq }
  0x94   :  { %v221_v62 = vpop.permute.xlu0 %220  ;;  %365 = vtanh.f32 %v205_v59 }
  0x95   :  { %v356_v63 = vpop.eup %355  ;;  %v238_v0 = vmul.f32 %v352_v60, %v221_v62  ;;  %v239_v1 = vmul.f32 %v354_v61, %v221_v62  ;;  %v226_v2 = vpop.permute.xlu1 %225  ;;  %vm314_vm9 = vcmp.lt.s32.totalorder %v312_v58, 256 }
  0x96   :  { %v358_v3 = vpop.eup %357  ;;  %v240_v4 = vmul.f32 %v356_v63, %v226_v2 }
  0x97   :  { %v360_v7 = vpop.eup %359  ;;  %v241_v8 = vmul.f32 %v358_v3, %v226_v2 }
  0x98   :  { %v362_v9 = vpop.eup %361  ;;  %v246_v11 = vadd.f32 %v240_v4, %v238_v0  ;;  %v242_v12 = vmul.f32 %v360_v7, %v231_v10 }
  0x99   :  { %v255_v5 = vadd.f32 %v241_v8, %v239_v1  ;;  %v243_v13 = vmul.f32 %v362_v9, %v231_v10  ;;  %v364_v14 = vpop.eup %363 }
  0x9a   :  { %v366_v6 = vpop.eup %365  ;;  %v247_v18 = vadd.f32 %v246_v11, %v242_v12 }
  0x9b   :  { %v256_v19 = vadd.f32 %v255_v5, %v243_v13 }
  0x9c   :  { %v236_v15 = vpop.permute.xlu0 %235 }
  0x9d   :  { %v244_v16 = vmul.f32 %v364_v14, %v236_v15  ;;  %v245_v17 = vmul.f32 %v366_v6, %v236_v15 }
  0x9f   :  { %v248_v20 = vadd.f32 %v247_v18, %v244_v16  ;;  %v257_v21 = vadd.f32 %v256_v19, %v245_v17 }
  0xa1   :  { %v249_v22 = vrot.slane %v248_v20, 4  ;;  %v258_v23 = vrot.slane %v257_v21, 4 }
  0xa3   :  { %v250_v24 = vadd.f32 %v249_v22, %v248_v20  ;;  %v259_v25 = vadd.f32 %v258_v23, %v257_v21 }
  0xa5   :  { %v251_v26 = vrot.slane %v250_v24, 2  ;;  %v260_v27 = vrot.slane %v259_v25, 2 }
  0xa7   :  { %v252_v28 = vadd.f32 %v251_v26, %v250_v24  ;;  %v261_v29 = vadd.f32 %v260_v27, %v259_v25 }
  0xa9   :  { %v253_v30 = vrot.slane %v252_v28, 1  ;;  %v262_v31 = vrot.slane %v261_v29, 1 }
  0xab   :  { %v254_v33 = vadd.f32 %v253_v30, %v252_v28  ;;  %v263_v34 = vadd.f32 %v262_v31, %v261_v29 }
  0xad   :  { %v266_v35 = vadd.f32 %v265_v32, %v254_v33  ;;  %v267_v36 = vadd.f32 %v265_v32, %v263_v34 }
  0xaf   :  { %v334_v37 = vmul.f32 -1.442695, %v266_v35  ;;  %v335_v38 = vmul.f32 -1.442695, %v267_v36 }
  0xb1   :  { %367 = vpow2.f32 %v334_v37 }
  0xb2   :  { %369 = vpow2.f32 %v335_v38 }
  0xb7   :  { %v368_v39 = vpop.eup %367 }
  0xb8   :  { %v370_v40 = vpop.eup %369  ;;  %v274_v41 = vadd.f32 1.0, %v368_v39 }
  0xb9   :  { %v275_v42 = vadd.f32 1.0, %v370_v40 }
  0xba   :  { %371 = vrcp.f32 %v274_v41  ;;  %vm281_vm2 = vweird.f32 %v274_v41  ;;  %v287_v54 = vand.u32 2147483648, %v274_v41  ;;  %v285_v56 = vand.u32 2147483647, %v274_v41 }
  0xbb   :  { %373 = vrcp.f32 %v275_v42  ;;  %v302_v50 = vand.u32 2147483648, %v275_v42  ;;  %v300_v52 = vand.u32 2147483647, %v275_v42  ;;  %vm296_vm4 = vweird.f32 %v275_v42 }
  0xbc   :  { %v288_v62 = vor.u32 1.1754944e-38, %v287_v54  ;;  %vm286_vm8 = vcmp.eq.f32.partialorder %v285_v56, 8.507059e+37 }
  0xbd   :  { %v303_v59 = vor.u32 1.1754944e-38, %v302_v50  ;;  %vm301_vm6 = vcmp.eq.f32.partialorder %v300_v52, 8.507059e+37 }
  0xc0   :  { %v372_v43 = vpop.eup %371 }
  0xc1   :  { %v374_v44 = vpop.eup %373  ;;  %v277_v45 = vmul.f32 %v372_v43, %v274_v41  ;;  %vm282_vm0 = vweird.f32 %v372_v43 }
  0xc2   :  { %v292_v46 = vmul.f32 %v374_v44, %v275_v42  ;;  %vm297_vm1 = vweird.f32 %v374_v44  ;;  %vm511_vm3 = vmor %vm281_vm2, %vm282_vm0 }
  0xc3   :  { %v278_v47 = vsub.f32 1.0, %v277_v45  ;;  %vm298_vm5 = vmor %vm296_vm4, %vm297_vm1 }
  0xc4   :  { %v293_v48 = vsub.f32 1.0, %v292_v46 }
  0xc5   :  { %v279_v49 = vmul.f32 %v372_v43, %v278_v47 }
  0xc6   :  { %v294_v51 = vmul.f32 %v374_v44, %v293_v48 }
  0xc7   :  { %v280_v53 = vadd.f32 %v372_v43, %v279_v49 }
  0xc8   :  { %v295_v57 = vadd.f32 %v374_v44, %v294_v51 }
  0xc9   :  { %v284_v60 = vsel %vm511_vm3, %v372_v43, %v280_v53 }
  0xca   :  { %v299_v61 = vsel %vm298_vm5, %v374_v44, %v295_v57  ;;  %v289_v1 = vsel %vm286_vm8, %v288_v62, %v284_v60 }
  0xcb   :  { %v304_v63 = vsel %vm301_vm6, %v303_v59, %v299_v61 }
  0xcc   :  { %v308_v0 = vrot.slane %v304_v63, 7 }
  0xce   :  { %v310_v2 = vsel %vm309_vm7, %v289_v1, %v308_v0 }
  0xcf   :  { %316 = vst.msk [vmem:[#allocation3] sm:$0x3] %vm314_vm9, %v310_v2 }
  0xd0   :  { %327 = dma.vmem_to_hbm [thread:$0]  %s323_s19, 32, %s325_s22, [#allocation4]  }
  0xd1   :  { %399 = dma.done.wait [#allocation4], 32  }
  0xd2   :  { %400 = vsyncadd [#allocation4], 4294967264 }
  0xd3   :  { %332 = vsyncpa [#allocation4], 1 }

</bundles_post_ra>
